<compile_context>
chip_gen: v7x
topology: tpu7x:2x2x1
jax: 0.10.0
libtpu: 0.0.40
codegen_flags: <defaults>
</compile_context>

<pallas_src>
import functools
from typing import NamedTuple

import numpy as np

import jax
import jax.numpy as jnp
from jax import lax
from jax.experimental import pallas as pl
from jax.experimental.pallas import tpu as pltpu

# ----------------------------------------------------------------------------
# Op banks (stand-ins for the missing `combine` / `select` helpers)
# ----------------------------------------------------------------------------
_N_UNARY = 3   # identity, square, tanh
_N_BINARY = 2  # add, mul (over all unordered feature pairs)
_LANE = 128
_SUBLANE = 8


def combine(n, bin=False):
    if bin:
        return (n * (n - 1) // 2) * _N_BINARY
    return n * _N_UNARY


def _pairs(n_in):
    return [(a, b) for a in range(n_in) for b in range(a + 1, n_in)]


def _round_up(a, m):
    return (a + m - 1) // m * m


class _LayerMeta(NamedTuple):
    n_in: int
    n_out: int
    n_cand: int
    binary: bool
    slots: dict        # name -> (row_offset, rows, cols) in the packed buffer


# ----------------------------------------------------------------------------
# Pack every parameter + static helper matrix into ONE lane-padded buffer
# ----------------------------------------------------------------------------
def _plan_and_pack(model, all_params):
    n_layers = len(model) - 1
    f_out = _round_up(max(model[-1], 1), _LANE)   # lane-dense final-x width
    f_form = _LANE                                 # lane-dense formula row width

    per_layer_arrays = []
    cfgs = []
    for i in range(n_layers):
        binary = (i % 2 != 0)
        n_in, n_out = model[i], model[i + 1]
        n_cand = combine(n_in, bin=binary)
        D = n_out * n_cand
        gamma, beta, w1, b1, w2, b2, w3 = all_params[i]

        arrs = {}
        arrs["gamma"] = jnp.reshape(gamma, (1, n_in))
        arrs["beta"] = jnp.reshape(beta, (1, n_in))
        arrs["b1"] = jnp.reshape(b1, (1, 4 * D))
        arrs["b2"] = jnp.reshape(b2, (1, D))
        arrs["w1"] = w1                                   # (n_in, 4D)
        arrs["w2"] = w2                                   # (4D, D)
        arrs["w3"] = w3                                   # (D, D)
        if binary:
            prs = _pairs(n_in)
            sel_a = np.zeros((n_in, len(prs)), np.float32)
            sel_b = np.zeros((n_in, len(prs)), np.float32)
            for k, (a, b) in enumerate(prs):
                sel_a[a, k] = 1.0
                sel_b[b, k] = 1.0
            arrs["sel_a"] = sel_a
            arrs["sel_b"] = sel_b
        # candidate replication: cand_t = cand @ rep     (C, n_out*C)
        arrs["rep"] = np.tile(np.eye(n_cand, dtype=np.float32), (1, n_out))
        # segment sum: x_new = (p * cand_t) @ seg        (n_out*C, n_out)
        seg = np.kron(np.eye(n_out, dtype=np.float32),
                      np.ones((n_cand, 1), np.float32))
        if i == n_layers - 1:                             # lane-pad final output
            seg = np.pad(seg, ((0, 0), (0, f_out - n_out)))
        arrs["seg"] = seg
        # segment membership mask / within-segment column indices (for `form`)
        arrs["maskf"] = np.kron(np.eye(n_out, dtype=np.float32),
                                np.ones((1, n_cand), np.float32))
        arrs["cidx"] = np.tile(
            np.tile(np.arange(n_cand, dtype=np.float32), n_out)[None, :],
            (n_out, 1))
        # placement: (n_out, 1) argmax column -> (1, f_form) lane-dense row
        arrs["place"] = np.eye(n_out, f_form, dtype=np.float32)

        per_layer_arrays.append(arrs)
        cfgs.append((n_in, n_out, n_cand, binary))

    c_pad = _LANE
    for arrs in per_layer_arrays:
        for a in arrs.values():
            c_pad = max(c_pad, _round_up(a.shape[1], _LANE))

    blocks = []
    layers = []
    row = 0
    for (n_in, n_out, n_cand, binary), arrs in zip(cfgs, per_layer_arrays):
        slots = {}
        for name, a in arrs.items():
            a = jnp.asarray(a, jnp.float32)
            r, c = a.shape
            slots[name] = (row, r, c)
            rr = _round_up(r, _SUBLANE)                   # 8-row aligned sections
            blocks.append(jnp.pad(a, ((0, rr - r), (0, c_pad - c))))
            row += rr
        layers.append(_LayerMeta(n_in, n_out, n_cand, binary, slots))

    pbuf = jnp.concatenate(blocks, axis=0)                # (rows_total, c_pad)
    return pbuf, tuple(layers), f_out, f_form


# ----------------------------------------------------------------------------
# Single fused kernel: all encoder layers + candidates + reduction + form
# ----------------------------------------------------------------------------
def _formuler_kernel(x_ref, pbuf_ref, x_out_ref, formula_ref, *, layers):
    x = x_ref[...].astype(jnp.float32)

    for li, L in enumerate(layers):
        n_cand = L.n_cand

        def rd(name, _slots=L.slots):
            r0, r, c = _slots[name]
            return pbuf_ref[r0:r0 + r, 0:c]

        gamma, beta = rd("gamma"), rd("beta")
        w1, b1 = rd("w1"), rd("b1")
        w2, b2 = rd("w2"), rd("b2")
        w3 = rd("w3")

        # ---- BatchNorm1d (training-mode batch stats), centered variance -----
        mean = jnp.mean(x, axis=0, keepdims=True)
        xc = x - mean
        var = jnp.mean(xc * xc, axis=0, keepdims=True)
        xn = xc * (gamma * lax.rsqrt(var + 1e-5)) + beta

        # ---- Linear -> ReLU -> Linear -> Linear(no bias) ---------------------
        h1 = jnp.maximum(
            jnp.dot(xn, w1, preferred_element_type=jnp.float32) + b1, 0.0)
        h2 = jnp.dot(h1, w2, preferred_element_type=jnp.float32) + b2
        h3 = jnp.dot(h2, w3, preferred_element_type=jnp.float32)     # (B, D3)

        # ---- Softmax over the flattened feature axis (exact) -----------------
        m = jnp.max(h3, axis=1, keepdims=True)
        e = jnp.exp(h3 - m)
        p = e / jnp.sum(e, axis=1, keepdims=True)

        # ---- Candidate op bank, vectorized over the whole (B, n_in) block ----
        if not L.binary:
            cand = jnp.concatenate([x, x * x, jnp.tanh(x)], axis=1)  # (B, C)
        else:
            sel_a, sel_b = rd("sel_a"), rd("sel_b")
            xa = jnp.dot(x, sel_a, preferred_element_type=jnp.float32)
            xb = jnp.dot(x, sel_b, preferred_element_type=jnp.float32)
            cand = jnp.concatenate([xa + xb, xa * xb], axis=1)       # (B, C)

        # ---- x_new[b, o] = sum_c p[b, o*C + c] * cand[b, c] -------------------
        # replication and segment-sum both on the MXU via packed 0/1 matrices.
        cand_t = jnp.dot(cand, rd("rep"), preferred_element_type=jnp.float32)
        x = jnp.dot(p * cand_t, rd("seg"), preferred_element_type=jnp.float32)

        # ---- `form` stand-in: argmax of batch-mean proba per output unit -----
        maskf, cidx, place = rd("maskf"), rd("cidx"), rd("place")
        mean_p = jnp.mean(p, axis=0, keepdims=True)                  # (1, D3)
        masked = mean_p * maskf - (1.0 - maskf)                      # (n_out, D3)
        seg_max = jnp.max(masked, axis=1, keepdims=True)             # (n_out, 1)
        idx = jnp.min(jnp.where(masked >= seg_max, cidx, float(n_cand)),
                      axis=1, keepdims=True)                         # (n_out, 1)
        row = jnp.sum(idx * place, axis=0, keepdims=True)            # (1, f_form)
        formula_ref[li:li + 1, :] = row.astype(jnp.int32)

    x_out_ref[...] = x                                               # (B, f_out)


# ----------------------------------------------------------------------------
# Parameters + wrapper
# ----------------------------------------------------------------------------
def init_params(model, key):
    all_params = []
    for i in range(len(model) - 1):
        odd = i % 2 != 0
        in_dim = model[i]
        out_dim = combine(model[i], bin=odd) * model[i + 1]
        k1, k2, k3, key = jax.random.split(key, 4)
        gamma = jnp.ones((1, in_dim), jnp.float32)            # BN weight
        beta = jnp.zeros((1, in_dim), jnp.float32)            # BN bias
        w1 = 0.1 * jax.random.normal(k1, (in_dim, out_dim * 4), jnp.float32)
        b1 = jnp.zeros((1, out_dim * 4), jnp.float32)
        w2 = 0.1 * jax.random.normal(k2, (out_dim * 4, out_dim), jnp.float32)
        b2 = jnp.zeros((1, out_dim), jnp.float32)
        w3 = 0.1 * jax.random.normal(k3, (out_dim, out_dim), jnp.float32)
        all_params.append((gamma, beta, w1, b1, w2, b2, w3))
    return all_params


def formuler_forward(x, model, all_params):
    n_layers = len(model) - 1
    B = x.shape[0]

    pbuf, layers, f_out, f_form = _plan_and_pack(model, all_params)

    # Advisory cost estimate for the XLA scheduler around the custom call.
    flops, transcendentals = 0, 0
    bytes_accessed = (int(x.size) + int(pbuf.size)) * 4
    for L in layers:
        D = L.n_out * L.n_cand
        flops += 10 * B * L.n_in                               # BatchNorm
        flops += 2 * B * L.n_in * 4 * D + B * 4 * D            # Linear1 + ReLU
        flops += 2 * B * 4 * D * D                             # Linear2
        flops += 2 * B * D * D                                 # Linear3
        flops += 8 * B * D                                     # softmax + product
        flops += 2 * B * L.n_cand * D + 2 * B * D * L.n_out    # rep + segment dots
        transcendentals += B * D + (0 if L.binary else B * L.n_in)
    bytes_accessed += (B * f_out + n_layers * f_form) * 4

    # Right-sized VMEM limit (actual data footprint is a few hundred KiB).
    data_bytes = (int(x.size) + int(pbuf.size) + B * f_out + n_layers * f_form) * 4
    vmem_limit = int(min(32 * 1024 * 1024, max(4 * 1024 * 1024, 4 * data_bytes)))

    kernel = functools.partial(_formuler_kernel, layers=layers)
    vmem = pl.BlockSpec(memory_space=pltpu.MemorySpace.VMEM)

    x_pad, formula_pad = pl.pallas_call(
        kernel,
        out_shape=(jax.ShapeDtypeStruct((B, f_out), jnp.float32),
                   jax.ShapeDtypeStruct((n_layers, f_form), jnp.int32)),
        in_specs=[vmem, vmem],
        out_specs=(vmem, vmem),
        compiler_params=pltpu.CompilerParams(vmem_limit_bytes=vmem_limit),
        cost_estimate=pl.CostEstimate(flops=int(flops),
                                      transcendentals=int(transcendentals),
                                      bytes_accessed=int(bytes_accessed)),
    )(x, pbuf)

    x_out = x_pad[:, :model[-1]]
    formula = [formula_pad[i:i + 1, :model[i + 1]] for i in range(n_layers)]
    return x_out, formula


# ----------------------------------------------------------------------------
# Pure-JAX reference (same stand-in op banks / ordering) for correctness check
# ----------------------------------------------------------------------------
def _reference_forward(x, model, all_params):
    for i in range(len(model) - 1):
        binary = (i % 2 != 0)
        n_in, n_out = model[i], model[i + 1]
        n_cand = combine(n_in, bin=binary)
        gamma, beta, w1, b1, w2, b2, w3 = all_params[i]
        mean = jnp.mean(x, axis=0, keepdims=True)
        var = jnp.mean((x - mean) ** 2, axis=0, keepdims=True)
        xn = (x - mean) / jnp.sqrt(var + 1e-5) * gamma + beta
        h1 = jnp.maximum(xn @ w1 + b1, 0.0)
        h2 = h1 @ w2 + b2
        h3 = h2 @ w3
        p = jax.nn.softmax(h3, axis=1)
        if not binary:
            cand = jnp.concatenate([x, x * x, jnp.tanh(x)], axis=1)
        else:
            prs = _pairs(n_in)
            sums = jnp.stack([x[:, a] + x[:, b] for (a, b) in prs], axis=1)
            prods = jnp.stack([x[:, a] * x[:, b] for (a, b) in prs], axis=1)
            cand = jnp.concatenate([sums, prods], axis=1)
        p3 = p.reshape(-1, n_out, n_cand)
        x = jnp.sum(p3 * cand[:, None, :], axis=2)
    return x


# ----------------------------------------------------------------------------
if __name__ == "__main__":
    model = [4, 3, 2]          # feature widths per stage (small, synthetic)
    batch = 8

    key = jax.random.PRNGKey(0)
    kx, kp = jax.random.split(key)
    x = jax.random.normal(kx, (batch, model[0]), jnp.float32)
    params = init_params(model, kp)

    out, formula = formuler_forward(x, model, params)
    out = jax.block_until_ready(out)
    formula = [jax.block_until_ready(f) for f in formula]

    # Shape / sanity / numerical checks against the pure-JAX reference.
    ref_out = _reference_forward(x, model, params)
    assert out.shape == (batch, model[-1])
    assert bool(jnp.all(jnp.isfinite(out)))
    assert jnp.allclose(out, ref_out, atol=1e-2, rtol=1e-2)
    for i, f in enumerate(formula):
        n_out_i = model[i + 1]
        n_cand_i = combine(model[i], bin=(i % 2 != 0))
        assert f.shape == (1, n_out_i)
        assert bool(jnp.all((f >= 0) & (f < n_cand_i)))

    print("KERNEL_OK")
</pallas_src>

<mosaic_0001>
module attributes {stable_mosaic.version = 11 : i64} {
  func.func @_formuler_kernel(%arg0: memref<8x4xf32, #tpu.memory_space<vmem>>, %arg1: memref<472x256xf32, #tpu.memory_space<vmem>>, %arg2: memref<8x128xf32, #tpu.memory_space<vmem>>, %arg3: memref<2x128xi32, #tpu.memory_space<vmem>>) attributes {dimension_semantics = [], scalar_prefetch = 0 : i64, scratch_operands = 0 : i64, tpu.core_type = #tpu.core_type<tc>} {
    %c0 = arith.constant 0 : index
    %c0_0 = arith.constant 0 : index
    %0 = vector.load %arg0[%c0, %c0_0] : memref<8x4xf32, #tpu.memory_space<vmem>>, vector<8x4xf32>
    %c0_1 = arith.constant 0 : index
    %c0_2 = arith.constant 0 : index
    %1 = vector.load %arg1[%c0_1, %c0_2] : memref<472x256xf32, #tpu.memory_space<vmem>>, vector<1x4xf32>
    %c8 = arith.constant 8 : index
    %c0_3 = arith.constant 0 : index
    %2 = vector.load %arg1[%c8, %c0_3] : memref<472x256xf32, #tpu.memory_space<vmem>>, vector<1x4xf32>
    %c32 = arith.constant 32 : index
    %c0_4 = arith.constant 0 : index
    %3 = vector.load %arg1[%c32, %c0_4] : memref<472x256xf32, #tpu.memory_space<vmem>>, vector<4x144xf32>
    %c16 = arith.constant 16 : index
    %c0_5 = arith.constant 0 : index
    %4 = vector.load %arg1[%c16, %c0_5] : memref<472x256xf32, #tpu.memory_space<vmem>>, vector<1x144xf32>
    %c40 = arith.constant 40 : index
    %c0_6 = arith.constant 0 : index
    %5 = vector.load %arg1[%c40, %c0_6] : memref<472x256xf32, #tpu.memory_space<vmem>>, vector<144x36xf32>
    %c24 = arith.constant 24 : index
    %c0_7 = arith.constant 0 : index
    %6 = vector.load %arg1[%c24, %c0_7] : memref<472x256xf32, #tpu.memory_space<vmem>>, vector<1x36xf32>
    %c184 = arith.constant 184 : index
    %c0_8 = arith.constant 0 : index
    %7 = vector.load %arg1[%c184, %c0_8] : memref<472x256xf32, #tpu.memory_space<vmem>>, vector<36x36xf32>
    %cst = arith.constant dense<0.000000e+00> : vector<4xf32>
    %8 = vector.multi_reduction <add>, %0, %cst [0] : vector<8x4xf32> to vector<4xf32>
    %9 = vector.shape_cast %8 : vector<4xf32> to vector<1x4xf32>
    %cst_9 = arith.constant 8.000000e+00 : f32
    %10 = vector.broadcast %cst_9 : f32 to vector<1x4xf32>
    %11 = arith.divf %9, %10 : vector<1x4xf32>
    %12 = vector.broadcast %11 : vector<1x4xf32> to vector<8x4xf32>
    %13 = arith.subf %0, %12 : vector<8x4xf32>
    %14 = arith.mulf %13, %13 : vector<8x4xf32>
    %cst_10 = arith.constant dense<0.000000e+00> : vector<4xf32>
    %15 = vector.multi_reduction <add>, %14, %cst_10 [0] : vector<8x4xf32> to vector<4xf32>
    %16 = vector.shape_cast %15 : vector<4xf32> to vector<1x4xf32>
    %cst_11 = arith.constant 8.000000e+00 : f32
    %17 = vector.broadcast %cst_11 : f32 to vector<1x4xf32>
    %18 = arith.divf %16, %17 : vector<1x4xf32>
    %cst_12 = arith.constant 9.99999974E-6 : f32
    %19 = vector.broadcast %cst_12 : f32 to vector<1x4xf32>
    %20 = arith.addf %18, %19 : vector<1x4xf32>
    %21 = math.rsqrt %20 : vector<1x4xf32>
    %22 = arith.mulf %1, %21 : vector<1x4xf32>
    %23 = vector.broadcast %22 : vector<1x4xf32> to vector<8x4xf32>
    %24 = arith.mulf %13, %23 : vector<8x4xf32>
    %25 = vector.broadcast %2 : vector<1x4xf32> to vector<8x4xf32>
    %26 = arith.addf %24, %25 : vector<8x4xf32>
    %cst_13 = arith.constant dense<0.000000e+00> : vector<8x144xf32>
    %27 = tpu.matmul %26, %3, %cst_13 {dimension_numbers = #tpu.dot_dimension_numbers<[1], [0], [0], [1], [0, 0, 1, 1], [], []>} : vector<8x4xf32>, vector<4x144xf32>, vector<8x144xf32> -> vector<8x144xf32>
    %28 = vector.broadcast %4 : vector<1x144xf32> to vector<8x144xf32>
    %29 = arith.addf %27, %28 : vector<8x144xf32>
    %cst_14 = arith.constant 0.000000e+00 : f32
    %30 = vector.broadcast %cst_14 : f32 to vector<8x144xf32>
    %31 = arith.maximumf %29, %30 : vector<8x144xf32>
    %cst_15 = arith.constant dense<0.000000e+00> : vector<8x36xf32>
    %32 = tpu.matmul %31, %5, %cst_15 {dimension_numbers = #tpu.dot_dimension_numbers<[1], [0], [0], [1], [0, 0, 1, 1], [], []>} : vector<8x144xf32>, vector<144x36xf32>, vector<8x36xf32> -> vector<8x36xf32>
    %33 = vector.broadcast %6 : vector<1x36xf32> to vector<8x36xf32>
    %34 = arith.addf %32, %33 : vector<8x36xf32>
    %cst_16 = arith.constant dense<0.000000e+00> : vector<8x36xf32>
    %35 = tpu.matmul %34, %7, %cst_16 {dimension_numbers = #tpu.dot_dimension_numbers<[1], [0], [0], [1], [0, 0, 1, 1], [], []>} : vector<8x36xf32>, vector<36x36xf32>, vector<8x36xf32> -> vector<8x36xf32>
    %cst_17 = arith.constant dense<0xFF800000> : vector<8xf32>
    %36 = vector.multi_reduction <maximumf>, %35, %cst_17 [1] : vector<8x36xf32> to vector<8xf32>
    %37 = vector.shape_cast %36 : vector<8xf32> to vector<8x1xf32>
    %38 = vector.broadcast %37 : vector<8x1xf32> to vector<8x36xf32>
    %39 = arith.subf %35, %38 : vector<8x36xf32>
    %40 = math.exp %39 : vector<8x36xf32>
    %cst_18 = arith.constant dense<0.000000e+00> : vector<8xf32>
    %41 = vector.multi_reduction <add>, %40, %cst_18 [1] : vector<8x36xf32> to vector<8xf32>
    %42 = vector.shape_cast %41 : vector<8xf32> to vector<8x1xf32>
    %43 = vector.broadcast %42 : vector<8x1xf32> to vector<8x36xf32>
    %44 = arith.divf %40, %43 : vector<8x36xf32>
    %45 = arith.mulf %0, %0 : vector<8x4xf32>
    %46 = math.tanh %0 : vector<8x4xf32>
    %47 = tpu.concatenate %0, %45, %46 in 1 : vector<8x4xf32>, vector<8x4xf32>, vector<8x4xf32> -> vector<8x12xf32>
    %c224 = arith.constant 224 : index
    %c0_19 = arith.constant 0 : index
    %48 = vector.load %arg1[%c224, %c0_19] : memref<472x256xf32, #tpu.memory_space<vmem>>, vector<12x36xf32>
    %cst_20 = arith.constant dense<0.000000e+00> : vector<8x36xf32>
    %49 = tpu.matmul %47, %48, %cst_20 {dimension_numbers = #tpu.dot_dimension_numbers<[1], [0], [0], [1], [0, 0, 1, 1], [], []>} : vector<8x12xf32>, vector<12x36xf32>, vector<8x36xf32> -> vector<8x36xf32>
    %50 = arith.mulf %44, %49 : vector<8x36xf32>
    %c240 = arith.constant 240 : index
    %c0_21 = arith.constant 0 : index
    %51 = vector.load %arg1[%c240, %c0_21] : memref<472x256xf32, #tpu.memory_space<vmem>>, vector<36x3xf32>
    %cst_22 = arith.constant dense<0.000000e+00> : vector<8x3xf32>
    %52 = tpu.matmul %50, %51, %cst_22 {dimension_numbers = #tpu.dot_dimension_numbers<[1], [0], [0], [1], [0, 0, 1, 1], [], []>} : vector<8x36xf32>, vector<36x3xf32>, vector<8x3xf32> -> vector<8x3xf32>
    %c280 = arith.constant 280 : index
    %c0_23 = arith.constant 0 : index
    %53 = vector.load %arg1[%c280, %c0_23] : memref<472x256xf32, #tpu.memory_space<vmem>>, vector<3x36xf32>
    %c288 = arith.constant 288 : index
    %c0_24 = arith.constant 0 : index
    %54 = vector.load %arg1[%c288, %c0_24] : memref<472x256xf32, #tpu.memory_space<vmem>>, vector<3x36xf32>
    %c296 = arith.constant 296 : index
    %c0_25 = arith.constant 0 : index
    %55 = vector.load %arg1[%c296, %c0_25] : memref<472x256xf32, #tpu.memory_space<vmem>>, vector<3x128xf32>
    %cst_26 = arith.constant dense<0.000000e+00> : vector<36xf32>
    %56 = vector.multi_reduction <add>, %44, %cst_26 [0] : vector<8x36xf32> to vector<36xf32>
    %57 = vector.shape_cast %56 : vector<36xf32> to vector<1x36xf32>
    %cst_27 = arith.constant 8.000000e+00 : f32
    %58 = vector.broadcast %cst_27 : f32 to vector<1x36xf32>
    %59 = arith.divf %57, %58 : vector<1x36xf32>
    %60 = vector.broadcast %59 : vector<1x36xf32> to vector<3x36xf32>
    %61 = arith.mulf %60, %53 : vector<3x36xf32>
    %cst_28 = arith.constant 1.000000e+00 : f32
    %62 = vector.broadcast %cst_28 : f32 to vector<3x36xf32>
    %63 = arith.subf %62, %53 : vector<3x36xf32>
    %64 = arith.subf %61, %63 : vector<3x36xf32>
    %cst_29 = arith.constant dense<0xFF800000> : vector<3xf32>
    %65 = vector.multi_reduction <maximumf>, %64, %cst_29 [1] : vector<3x36xf32> to vector<3xf32>
    %66 = vector.shape_cast %65 : vector<3xf32> to vector<3x1xf32>
    %67 = vector.broadcast %66 : vector<3x1xf32> to vector<3x36xf32>
    %68 = arith.cmpf oge, %64, %67 : vector<3x36xf32>
    %cst_30 = arith.constant 1.200000e+01 : f32
    %69 = vector.broadcast %cst_30 : f32 to vector<3x36xf32>
    %70 = arith.select %68, %54, %69 : vector<3x36xi1>, vector<3x36xf32>
    %cst_31 = arith.constant dense<0x7F800000> : vector<3xf32>
    %71 = vector.multi_reduction <minimumf>, %70, %cst_31 [1] : vector<3x36xf32> to vector<3xf32>
    %72 = vector.shape_cast %71 : vector<3xf32> to vector<3x1xf32>
    %73 = vector.broadcast %72 : vector<3x1xf32> to vector<3x128xf32>
    %74 = arith.mulf %73, %55 : vector<3x128xf32>
    %cst_32 = arith.constant dense<0.000000e+00> : vector<128xf32>
    %75 = vector.multi_reduction <add>, %74, %cst_32 [0] : vector<3x128xf32> to vector<128xf32>
    %76 = vector.shape_cast %75 : vector<128xf32> to vector<1x128xf32>
    %77 = arith.fptosi %76 : vector<1x128xf32> to vector<1x128xi32>
    %c0_33 = arith.constant 0 : index
    %c0_34 = arith.constant 0 : index
    %78 = vector.load %arg3[%c0_33, %c0_34] : memref<2x128xi32, #tpu.memory_space<vmem>>, vector<1x128xi32>
    tpu.vector_store %arg3[%c0_33, %c0_34], %77 {strides = array<i32>} : memref<2x128xi32, #tpu.memory_space<vmem>>, vector<1x128xi32>,
    %c304 = arith.constant 304 : index
    %c0_35 = arith.constant 0 : index
    %79 = vector.load %arg1[%c304, %c0_35] : memref<472x256xf32, #tpu.memory_space<vmem>>, vector<1x3xf32>
    %c312 = arith.constant 312 : index
    %c0_36 = arith.constant 0 : index
    %80 = vector.load %arg1[%c312, %c0_36] : memref<472x256xf32, #tpu.memory_space<vmem>>, vector<1x3xf32>
    %c336 = arith.constant 336 : index
    %c0_37 = arith.constant 0 : index
    %81 = vector.load %arg1[%c336, %c0_37] : memref<472x256xf32, #tpu.memory_space<vmem>>, vector<3x48xf32>
    %c320 = arith.constant 320 : index
    %c0_38 = arith.constant 0 : index
    %82 = vector.load %arg1[%c320, %c0_38] : memref<472x256xf32, #tpu.memory_space<vmem>>, vector<1x48xf32>
    %c344 = arith.constant 344 : index
    %c0_39 = arith.constant 0 : index
    %83 = vector.load %arg1[%c344, %c0_39] : memref<472x256xf32, #tpu.memory_space<vmem>>, vector<48x12xf32>
    %c328 = arith.constant 328 : index
    %c0_40 = arith.constant 0 : index
    %84 = vector.load %arg1[%c328, %c0_40] : memref<472x256xf32, #tpu.memory_space<vmem>>, vector<1x12xf32>
    %c392 = arith.constant 392 : index
    %c0_41 = arith.constant 0 : index
    %85 = vector.load %arg1[%c392, %c0_41] : memref<472x256xf32, #tpu.memory_space<vmem>>, vector<12x12xf32>
    %cst_42 = arith.constant dense<0.000000e+00> : vector<3xf32>
    %86 = vector.multi_reduction <add>, %52, %cst_42 [0] : vector<8x3xf32> to vector<3xf32>
    %87 = vector.shape_cast %86 : vector<3xf32> to vector<1x3xf32>
    %cst_43 = arith.constant 8.000000e+00 : f32
    %88 = vector.broadcast %cst_43 : f32 to vector<1x3xf32>
    %89 = arith.divf %87, %88 : vector<1x3xf32>
    %90 = vector.broadcast %89 : vector<1x3xf32> to vector<8x3xf32>
    %91 = arith.subf %52, %90 : vector<8x3xf32>
    %92 = arith.mulf %91, %91 : vector<8x3xf32>
    %cst_44 = arith.constant dense<0.000000e+00> : vector<3xf32>
    %93 = vector.multi_reduction <add>, %92, %cst_44 [0] : vector<8x3xf32> to vector<3xf32>
    %94 = vector.shape_cast %93 : vector<3xf32> to vector<1x3xf32>
    %cst_45 = arith.constant 8.000000e+00 : f32
    %95 = vector.broadcast %cst_45 : f32 to vector<1x3xf32>
    %96 = arith.divf %94, %95 : vector<1x3xf32>
    %cst_46 = arith.constant 9.99999974E-6 : f32
    %97 = vector.broadcast %cst_46 : f32 to vector<1x3xf32>
    %98 = arith.addf %96, %97 : vector<1x3xf32>
    %99 = math.rsqrt %98 : vector<1x3xf32>
    %100 = arith.mulf %79, %99 : vector<1x3xf32>
    %101 = vector.broadcast %100 : vector<1x3xf32> to vector<8x3xf32>
    %102 = arith.mulf %91, %101 : vector<8x3xf32>
    %103 = vector.broadcast %80 : vector<1x3xf32> to vector<8x3xf32>
    %104 = arith.addf %102, %103 : vector<8x3xf32>
    %cst_47 = arith.constant dense<0.000000e+00> : vector<8x48xf32>
    %105 = tpu.matmul %104, %81, %cst_47 {dimension_numbers = #tpu.dot_dimension_numbers<[1], [0], [0], [1], [0, 0, 1, 1], [], []>} : vector<8x3xf32>, vector<3x48xf32>, vector<8x48xf32> -> vector<8x48xf32>
    %106 = vector.broadcast %82 : vector<1x48xf32> to vector<8x48xf32>
    %107 = arith.addf %105, %106 : vector<8x48xf32>
    %cst_48 = arith.constant 0.000000e+00 : f32
    %108 = vector.broadcast %cst_48 : f32 to vector<8x48xf32>
    %109 = arith.maximumf %107, %108 : vector<8x48xf32>
    %cst_49 = arith.constant dense<0.000000e+00> : vector<8x12xf32>
    %110 = tpu.matmul %109, %83, %cst_49 {dimension_numbers = #tpu.dot_dimension_numbers<[1], [0], [0], [1], [0, 0, 1, 1], [], []>} : vector<8x48xf32>, vector<48x12xf32>, vector<8x12xf32> -> vector<8x12xf32>
    %111 = vector.broadcast %84 : vector<1x12xf32> to vector<8x12xf32>
    %112 = arith.addf %110, %111 : vector<8x12xf32>
    %cst_50 = arith.constant dense<0.000000e+00> : vector<8x12xf32>
    %113 = tpu.matmul %112, %85, %cst_50 {dimension_numbers = #tpu.dot_dimension_numbers<[1], [0], [0], [1], [0, 0, 1, 1], [], []>} : vector<8x12xf32>, vector<12x12xf32>, vector<8x12xf32> -> vector<8x12xf32>
    %cst_51 = arith.constant dense<0xFF800000> : vector<8xf32>
    %114 = vector.multi_reduction <maximumf>, %113, %cst_51 [1] : vector<8x12xf32> to vector<8xf32>
    %115 = vector.shape_cast %114 : vector<8xf32> to vector<8x1xf32>
    %116 = vector.broadcast %115 : vector<8x1xf32> to vector<8x12xf32>
    %117 = arith.subf %113, %116 : vector<8x12xf32>
    %118 = math.exp %117 : vector<8x12xf32>
    %cst_52 = arith.constant dense<0.000000e+00> : vector<8xf32>
    %119 = vector.multi_reduction <add>, %118, %cst_52 [1] : vector<8x12xf32> to vector<8xf32>
    %120 = vector.shape_cast %119 : vector<8xf32> to vector<8x1xf32>
    %121 = vector.broadcast %120 : vector<8x1xf32> to vector<8x12xf32>
    %122 = arith.divf %118, %121 : vector<8x12xf32>
    %c408 = arith.constant 408 : index
    %c0_53 = arith.constant 0 : index
    %123 = vector.load %arg1[%c408, %c0_53] : memref<472x256xf32, #tpu.memory_space<vmem>>, vector<3x3xf32>
    %c416 = arith.constant 416 : index
    %c0_54 = arith.constant 0 : index
    %124 = vector.load %arg1[%c416, %c0_54] : memref<472x256xf32, #tpu.memory_space<vmem>>, vector<3x3xf32>
    %cst_55 = arith.constant dense<0.000000e+00> : vector<8x3xf32>
    %125 = tpu.matmul %52, %123, %cst_55 {dimension_numbers = #tpu.dot_dimension_numbers<[1], [0], [0], [1], [0, 0, 1, 1], [], []>} : vector<8x3xf32>, vector<3x3xf32>, vector<8x3xf32> -> vector<8x3xf32>
    %cst_56 = arith.constant dense<0.000000e+00> : vector<8x3xf32>
    %126 = tpu.matmul %52, %124, %cst_56 {dimension_numbers = #tpu.dot_dimension_numbers<[1], [0], [0], [1], [0, 0, 1, 1], [], []>} : vector<8x3xf32>, vector<3x3xf32>, vector<8x3xf32> -> vector<8x3xf32>
    %127 = arith.addf %125, %126 : vector<8x3xf32>
    %128 = arith.mulf %125, %126 : vector<8x3xf32>
    %129 = tpu.concatenate %127, %128 in 1 : vector<8x3xf32>, vector<8x3xf32> -> vector<8x6xf32>
    %c424 = arith.constant 424 : index
    %c0_57 = arith.constant 0 : index
    %130 = vector.load %arg1[%c424, %c0_57] : memref<472x256xf32, #tpu.memory_space<vmem>>, vector<6x12xf32>
    %cst_58 = arith.constant dense<0.000000e+00> : vector<8x12xf32>
    %131 = tpu.matmul %129, %130, %cst_58 {dimension_numbers = #tpu.dot_dimension_numbers<[1], [0], [0], [1], [0, 0, 1, 1], [], []>} : vector<8x6xf32>, vector<6x12xf32>, vector<8x12xf32> -> vector<8x12xf32>
    %132 = arith.mulf %122, %131 : vector<8x12xf32>
    %c432 = arith.constant 432 : index
    %c0_59 = arith.constant 0 : index
    %133 = vector.load %arg1[%c432, %c0_59] : memref<472x256xf32, #tpu.memory_space<vmem>>, vector<12x128xf32>
    %cst_60 = arith.constant dense<0.000000e+00> : vector<8x128xf32>
    %134 = tpu.matmul %132, %133, %cst_60 {dimension_numbers = #tpu.dot_dimension_numbers<[1], [0], [0], [1], [0, 0, 1, 1], [], []>} : vector<8x12xf32>, vector<12x128xf32>, vector<8x128xf32> -> vector<8x128xf32>
    %c448 = arith.constant 448 : index
    %c0_61 = arith.constant 0 : index
    %135 = vector.load %arg1[%c448, %c0_61] : memref<472x256xf32, #tpu.memory_space<vmem>>, vector<2x12xf32>
    %c456 = arith.constant 456 : index
    %c0_62 = arith.constant 0 : index
    %136 = vector.load %arg1[%c456, %c0_62] : memref<472x256xf32, #tpu.memory_space<vmem>>, vector<2x12xf32>
    %c464 = arith.constant 464 : index
    %c0_63 = arith.constant 0 : index
    %137 = vector.load %arg1[%c464, %c0_63] : memref<472x256xf32, #tpu.memory_space<vmem>>, vector<2x128xf32>
    %cst_64 = arith.constant dense<0.000000e+00> : vector<12xf32>
    %138 = vector.multi_reduction <add>, %122, %cst_64 [0] : vector<8x12xf32> to vector<12xf32>
    %139 = vector.shape_cast %138 : vector<12xf32> to vector<1x12xf32>
    %cst_65 = arith.constant 8.000000e+00 : f32
    %140 = vector.broadcast %cst_65 : f32 to vector<1x12xf32>
    %141 = arith.divf %139, %140 : vector<1x12xf32>
    %142 = vector.broadcast %141 : vector<1x12xf32> to vector<2x12xf32>
    %143 = arith.mulf %142, %135 : vector<2x12xf32>
    %cst_66 = arith.constant 1.000000e+00 : f32
    %144 = vector.broadcast %cst_66 : f32 to vector<2x12xf32>
    %145 = arith.subf %144, %135 : vector<2x12xf32>
    %146 = arith.subf %143, %145 : vector<2x12xf32>
    %cst_67 = arith.constant dense<0xFF800000> : vector<2xf32>
    %147 = vector.multi_reduction <maximumf>, %146, %cst_67 [1] : vector<2x12xf32> to vector<2xf32>
    %148 = vector.shape_cast %147 : vector<2xf32> to vector<2x1xf32>
    %149 = vector.broadcast %148 : vector<2x1xf32> to vector<2x12xf32>
    %150 = arith.cmpf oge, %146, %149 : vector<2x12xf32>
    %cst_68 = arith.constant 6.000000e+00 : f32
    %151 = vector.broadcast %cst_68 : f32 to vector<2x12xf32>
    %152 = arith.select %150, %136, %151 : vector<2x12xi1>, vector<2x12xf32>
    %cst_69 = arith.constant dense<0x7F800000> : vector<2xf32>
    %153 = vector.multi_reduction <minimumf>, %152, %cst_69 [1] : vector<2x12xf32> to vector<2xf32>
    %154 = vector.shape_cast %153 : vector<2xf32> to vector<2x1xf32>
    %155 = vector.broadcast %154 : vector<2x1xf32> to vector<2x128xf32>
    %156 = arith.mulf %155, %137 : vector<2x128xf32>
    %cst_70 = arith.constant dense<0.000000e+00> : vector<128xf32>
    %157 = vector.multi_reduction <add>, %156, %cst_70 [0] : vector<2x128xf32> to vector<128xf32>
    %158 = vector.shape_cast %157 : vector<128xf32> to vector<1x128xf32>
    %159 = arith.fptosi %158 : vector<1x128xf32> to vector<1x128xi32>
    %c1 = arith.constant 1 : index
    %c0_71 = arith.constant 0 : index
    %160 = vector.load %arg3[%c1, %c0_71] : memref<2x128xi32, #tpu.memory_space<vmem>>, vector<1x128xi32>
    tpu.vector_store %arg3[%c1, %c0_71], %159 {strides = array<i32>} : memref<2x128xi32, #tpu.memory_space<vmem>>, vector<1x128xi32>,
    %c0_72 = arith.constant 0 : index
    %c0_73 = arith.constant 0 : index
    %161 = vector.load %arg2[%c0_72, %c0_73] : memref<8x128xf32, #tpu.memory_space<vmem>>, vector<8x128xf32>
    tpu.vector_store %arg2[%c0_72, %c0_73], %134 {strides = array<i32>} : memref<8x128xf32, #tpu.memory_space<vmem>>, vector<8x128xf32>,
    return
  }
}

</mosaic_0001>

<bundles_post_ra>
// kernel: tpu_custom_call.1
= control target key start
LH: loop header
LB: loop body
LE: loop exit
PB: predicated region body
PF: predicated region fallthrough
CT: control target
= control target key end

     0   :  { %9 = vsyncpa [#allocation3], 0  ;;  %s1686_s0 = inlined_call_operand.vmem [shape: f32[8,4], index: 0, kind: input, shape index: {}]   ;;  %s1687_s1 = inlined_call_operand.hbm [shape: f32[472,256], index: 1, kind: input, shape index: {}]   ;;  %s1688_s2 = inlined_call_operand.hbm [shape: f32[8,128], index: 2, kind: output, shape index: {0}]   ;;  %s1689_s3 = inlined_call_operand.hbm [shape: s32[2,128], index: 3, kind: output, shape index: {1}]  }
   0x1   :  { %10 = vsyncpa [#allocation4], 0 }
   0x2   :  { %11 = vsyncpa [#allocation7], 0  ;;  %s1507_s12 = smov [#allocation2]   ;;  %s1435_s16 = scalar_lea.hbm %s1687_s1, 15104 }
   0x3   :  { %s19_s13 = sshll.u32 %s1507_s12, 4  ;;  %p1436_p0 = scmp.ne.s32.totalorder %s1687_s1, %s1435_s16  ;;  %s20_s13 = int_to_ptr.vmem [resolvable:$true] %s19_s13 }
   0x4   :  { %p1439_p1 = scmp.lt.u32.totalorder %s1435_s16, %s1687_s1 }
   0x6   :  { %p1441_p2 = pnand %p1439_p1, %p1436_p0 }
   0x8   :  { %1444 = shalt.err (!%p1441_p2)
}
   0x9   :  { %s1445_s21 = scalar_lea.vmem %s20_s13, 15104  ;;  %p1450_p4 = scmp.lt.s32.totalorder %s20_s13, %s20_s13 }
   0xa   :  { %p1446_p3 = scmp.ne.s32.totalorder %s20_s13, %s1445_s21  ;;  %p1451_p5 = scmp.lt.s32.totalorder %s1445_s21, %s1445_s21 }
   0xc   :  { %p1452_p6 = por %p1451_p5, %p1450_p4 }
   0xe   :  { %p1453_p7 = pnand %p1452_p6, %p1446_p3 }
  0x10   :  { %1456 = shalt.err (!%p1453_p7)
}
  0x11   :  { %s1508_s22 = smov 256   ;;  %s1509_s23 = smov 16  }
  0x12   :  { %25 = dma.hbm_to_vmem [thread:$0]  %s1687_s1, 15104, %s20_s13, [#allocation3], %s1508_s22, %s1508_s22, %s1509_s23  }
  0x13   :  { %1501 = dma.done.wait [#allocation3], 15104  }
  0x14   :  { %1502 = vsyncadd [#allocation3], 4294952192  ;;  %v1510_v0 = vmov 0.0   ;;  %v1511_v1 = vmov 0.0|0.0   ;;  %vm99_vm0 = vcmask 1043456   ;;  %vm60_vm1 = vcmask 31744  }
  0x15   :  { %170 = vmatprep.mubr.f32.mxu0 %v1510_v0  ;;  %1345 = vmatprep.subr.bf16.mxu1 %v1511_v1  ;;  %v33_v2 = vld [vmem:[#allocation2 + $0x48] sm:$0xf]  ;;  %v32_v3 = vld [vmem:[#allocation2 + $0x40] sm:$0xf]  ;;  %v36_v6 = vld [vmem:[#allocation2 + $0x50] sm:$0xff]  ;;  %v86_v63 = vlaneseq  ;;  %vm179_vm2 = vcmask 130048  }
  0x16   :  { %v1556_v4 = vld [vmem:[%s1686_s0] sm:$0xff]  ;;  %1204 = vmatprep.subr.msk.mxu0 %vm99_vm0, %v33_v2  ;;  %v38_v9 = vld [vmem:[#allocation2 + $0x70] sm:$0xff]  ;;  %vm1512_vm3 = vmmov 0   ;;  %s1513_s0 = smov 4   ;;  %s1514_s1 = smov 8   ;;  %vm253_vm4 = vcmask 293888  }
  0x17   :  { %v61_v5 = vsel %vm60_vm1, %v1556_v4, 0.0  ;;  %1205 = vmatpush1.msk.msra.mxu0 %vm99_vm0, %v32_v3  ;;  %v37_v8 = vld [vmem:[#allocation2 + $0x60] sm:$0xff]  ;;  %v40_v15 = vld [vmem:[#allocation2 + $0x90] sm:$0xff]  ;;  %v87_v2 = vshrl.u32 %v86_v63, 7  ;;  %vm1515_vm5 = vmmov 1   ;;  %vm352_vm7 = vcmask 64512  }
  0x18   :  { %v62_v7 = vrot.slane %v61_v5, 4  ;;  %v39_v10 = vld [vmem:[#allocation2 + $0x80] sm:$0xff]  ;;  %v1346_v11 = vpack.c.bf16 %v37_v8, %v36_v6  ;;  %1372 = vmatprep.subr.bf16.mxu0 %v1511_v1  ;;  %v42_v20 = vld [vmem:[#allocation2 + $0xb0] sm:$0xff]  ;;  %vm1590_vm6 = vmpackc.low %vm99_vm0, %vm1515_vm5  ;;  %vm356_vm8 = vcmask 97280   ;;  %vm539_vm9 = vcmask 1042432   ;;  %s1516_s28 = smov 3  }
  0x19   :  { %v1349_v13 = vpack.c.bf16 %v39_v10, %v38_v9  ;;  %v41_v16 = vld [vmem:[#allocation2 + $0xa0] sm:$0xff]  ;;  %v44_v25 = vld [vmem:[#allocation2 + $0xd0] sm:$0xff]  ;;  %v88_v3 = vsub.s32 0, %v87_v2  ;;  %v92_v6 = vsub.s32 1, %v87_v2  ;;  %vm562_vm10 = vcmask 23552   ;;  %s1517_s29 = smov [#allocation5]  }
  0x1a   :  { %v63_v12 = vadd.f32 %v62_v7, %v61_v5  ;;  %1347 = vmatpush1.bf16.msra.mxu1 %v1346_v11  ;;  %v1352_v18 = vpack.c.bf16 %v41_v16, %v40_v15  ;;  %v43_v21 = vld [vmem:[#allocation2 + $0xc0] sm:$0xff]  ;;  %v46_v30 = vld [vmem:[#allocation2 + $0xf0] sm:$0xff]  ;;  %v341_v16 = vmul.f32 %v1556_v4, %v1556_v4  ;;  %vm663_vm11 = vcmask 392192   ;;  %s1181_s30 = sshll.u32 %s1517_s29, 4  ;;  %s1182_s30 = int_to_ptr.vmem [resolvable:$true] %s1181_s30 }
  0x1b   :  { %1348 = vmatprep.subr.bf16.mxu1 %v1511_v1  ;;  %v1355_v23 = vpack.c.bf16 %v43_v21, %v42_v20  ;;  %v45_v26 = vld [vmem:[#allocation2 + $0xe0] sm:$0xff]  ;;  %v48_v35 = vld [vmem:[#allocation2 + $0x110] sm:$0xff]  ;;  %vm987_vm12 = vcmask 1045504   ;;  %vm529_vm13 = vcmask 288768   ;;  %vm983_vm14 = vcmask 48128   ;;  %s1457_s4 = scalar_lea.vmem %s1182_s30, 128  ;;  %p1462_p9 = scmp.lt.s32.totalorder %s1182_s30, %s1182_s30 }
  0x1c   :  { %v64_v14 = vrot.slane %v63_v12, 2  ;;  %v1358_v28 = vpack.c.bf16 %v45_v26, %v44_v25  ;;  %v47_v31 = vld [vmem:[#allocation2 + $0x100] sm:$0xff]  ;;  %v31_v48 = vld [vmem:[#allocation2 + $0x10] ss:$0 sm:$0xff]  ;;  %344 = vrot.lane.b32.xlu0 %v341_v16, %s1513_s0  ;;  %vm1154_vm15 = vcmask 91136   ;;  %p1458_p8 = scmp.ne.s32.totalorder %s1182_s30, %s1457_s4  ;;  %p1463_p10 = scmp.lt.s32.totalorder %s1457_s4, %s1457_s4 }
  0x1d   :  { %v1361_v34 = vpack.c.bf16 %v47_v31, %v46_v30  ;;  %v49_v36 = vld [vmem:[#allocation2 + $0x120] sm:$0xff]  ;;  %v50_v51 = vld [vmem:[#allocation2 + $0x130] sm:$0xff] }
  0x1e   :  { %v65_v17 = vadd.f32 %v64_v14, %v63_v12  ;;  %1350 = vmatpush1.bf16.msra.mxu1 %v1349_v13  ;;  %v1364_v39 = vpack.c.bf16 %v49_v36, %v48_v35  ;;  %v30_v45 = vld [vmem:[#allocation2] ss:$0 sm:$0xff]  ;;  %v52_v54 = vld [vmem:[#allocation2 + $0x150] sm:$0xff]  ;;  %p1464_p11 = por %p1463_p10, %p1462_p9 }
  0x1f   :  { %1351 = vmatprep.subr.bf16.mxu1 %v1511_v1  ;;  %v51_v52 = vld [vmem:[#allocation2 + $0x140] sm:$0xff]  ;;  %v55_v57 = vld [vmem:[#allocation2 + $0x170] sm:$0xff] }
  0x20   :  { %v66_v19 = vrot.slane %v65_v17, 1  ;;  %v1367_v53 = vpack.c.bf16 %v51_v52, %v50_v51  ;;  %v53_v55 = vld [vmem:[#allocation2 + $0x160] sm:$0xff]  ;;  %v57_v59 = vld [vmem:[#allocation2 + $0x190] sm:$0xff]  ;;  %p1465_p12 = pnand %p1464_p11, %p1458_p8 }
  0x21   :  { %v1370_v56 = vpack.c.bf16 %v53_v55, %v52_v54  ;;  %v56_v58 = vld [vmem:[#allocation2 + $0x180] sm:$0xff]  ;;  %v59_v15 = vld [vmem:[#allocation2 + $0x1b0] sm:$0xf] }
  0x22   :  { %v67_v22 = vadd.f32 %v66_v19, %v65_v17  ;;  %1353 = vmatpush1.bf16.msra.mxu1 %v1352_v18  ;;  %v1373_v60 = vpack.c.bf16 %v56_v58, %v55_v57  ;;  %v58_v61 = vld [vmem:[#allocation2 + $0x1a0] sm:$0xff]  ;;  %v54_v18 = vld [vmem:[#allocation2 + $0x30] ss:$0 sm:$0xff] }
  0x23   :  { %1354 = vmatprep.subr.bf16.mxu1 %v1511_v1  ;;  %v1376_v62 = vpack.c.bf16 %v58_v61, %v57_v59  ;;  %v35_v5 = vld [vmem:[#allocation2 + $0x20] ss:$8 sm:$0x3]  ;;  %v550_v16 = vld [vmem:[#allocation2 + $0x270] ss:$0 sm:$0xff] }
  0x24   :  { %v69_v24 = vmul.f32 0.125, %v67_v22  ;;  %v89_v7 = vrot.slane %v35_v5, %v88_v3  ;;  %v93_v8 = vrot.slane %v35_v5, %v92_v6 }
  0x26   :  { %v70_v27 = vsub.f32 %v1556_v4, %v69_v24  ;;  %1356 = vmatpush1.bf16.msra.mxu1 %v1355_v23  ;;  %v354_v23 = vld [vmem:[#allocation2 + $0x1c0] sm:$0xff]  ;;  %v355_v24 = vld [vmem:[#allocation2 + $0x1d0] sm:$0xf] }
  0x27   :  { %1357 = vmatprep.subr.bf16.mxu1 %v1511_v1  ;;  %v1379_v25 = vpack.c.bf16 %v355_v24, %v354_v23  ;;  %v557_v23 = vld [vmem:[#allocation2 + $0x2f0] sm:$0xff]  ;;  %v558_v24 = vld [vmem:[#allocation2 + $0x300] sm:$0xff] }
  0x28   :  { %v71_v29 = vmul.f32 %v70_v27, %v70_v27 }
  0x2a   :  { %v72_v32 = vsel %vm60_vm1, %v71_v29, 0.0  ;;  %1359 = vmatpush1.bf16.msra.mxu1 %v1358_v28 }
  0x2b   :  { %v73_v33 = vrot.slane %v72_v32, 4  ;;  %1360 = vmatprep.subr.bf16.mxu1 %v1511_v1 }
  0x2d   :  { %v74_v37 = vadd.f32 %v73_v33, %v72_v32 }
  0x2e   :  { %1362 = vmatpush1.bf16.msra.mxu1 %v1361_v34 }
  0x2f   :  { %v75_v38 = vrot.slane %v74_v37, 2  ;;  %1363 = vmatprep.subr.bf16.mxu1 %v1511_v1 }
  0x31   :  { %v76_v40 = vadd.f32 %v75_v38, %v74_v37  ;;  %v434_v37 = vld [vmem:[#allocation2 + $0x1e0] sm:$0xff]  ;;  %v435_v38 = vld [vmem:[#allocation2 + $0x1f0] sm:$0xff] }
  0x32   :  { %1365 = vmatpush1.bf16.msra.mxu1 %v1364_v39  ;;  %v1383_v39 = vpack.c.bf16 %v435_v38, %v434_v37 }
  0x33   :  { %v77_v41 = vrot.slane %v76_v40, 1  ;;  %1366 = vmatprep.subr.bf16.mxu1 %v1511_v1 }
  0x35   :  { %v78_v42 = vadd.f32 %v77_v41, %v76_v40  ;;  %v436_v40 = vld [vmem:[#allocation2 + $0x200] sm:$0xff]  ;;  %v437_v41 = vld [vmem:[#allocation2 + $0x210] sm:$0xff] }
  0x36   :  { %1368 = vmatpush1.bf16.msra.mxu1 %v1367_v53 }
  0x37   :  { %v79_v43 = vmul.f32 0.125, %v78_v42  ;;  %1369 = vmatprep.subr.bf16.mxu1 %v1511_v1 }
  0x39   :  { %v80_v44 = vadd.f32 1e-05, %v79_v43  ;;  %v1386_v43 = vpack.c.bf16 %v437_v41, %v436_v40 }
  0x3a   :  { %1371 = vmatpush1.bf16.msra.mxu1 %v1370_v56 }
  0x3b   :  { %1421 = vrsqrt.f32 %v80_v44  ;;  %1397 = vmatprep.subr.bf16.mxu1 %v1511_v1 }
  0x3c   :  { %1423 = vtanh.f32 %v1556_v4 }
  0x45   :  { %v1422_v46 = vpop.eup %1421 }
  0x46   :  { %v82_v47 = vmul.f32 %v1422_v46, %v30_v45  ;;  %v1424_v17 = vpop.eup %1423  ;;  %v438_v45 = vld [vmem:[#allocation2 + $0x220] sm:$0xf] }
  0x47   :  { %348 = vrot.lane.b32.xlu0 %v1424_v17, %s1514_s1 }
  0x48   :  { %v83_v49 = vmul.f32 %v82_v47, %v70_v27 }
  0x4a   :  { %v84_v50 = vadd.f32 %v83_v49, %v31_v48 }
  0x4c   :  { %1206 = vmatmul.mubr.msk.f32.vlgmr.msra.gmra.mrb[0].mxu0 %vm60_vm1, %v84_v50  ;;  %v551_v50 = vld [vmem:[#allocation2 + $0x2a0] sm:$0x7] }
  0x4d   :  { %1374 = vmatpush3.bf16.msra.mxu0 %v1373_v60  ;;  %1273 = vmatprep.mubr.msk.f32.mxu0 %vm1512_vm3, %v1510_v0 }
  0x4e   :  { %1375 = vmatprep.subr.bf16.mxu0 %v1511_v1 }
  0x51   :  { %1377 = vmatpush3.bf16.msra.mxu0 %v1376_v62 }
  0x52   :  { %1271 = vmatprep.subr.mxu0 %v1510_v0 }
  0x55   :  { %1272 = vmatpush3.msk.msra.mxu0 %vm99_vm0, %v59_v15  ;;  %v554_v15 = vld [vmem:[#allocation2 + $0x2c0] sm:$0xff] }
  0x56   :  { %1378 = vmatprep.subr.bf16.mxu0 %v1511_v1 }
  0x8e   :  { %v345_v22 = vpop.permute.xlu0 %344 }
  0x8f   :  { %v351_v27 = vsel %vm60_vm1, %v1556_v4, %v345_v22 }
  0xb9   :  { %v349_v28 = vpop.permute.xlu0 %348 }
  0xba   :  { %v353_v29 = vsel %vm352_vm7, %v351_v27, %v349_v28  ;;  %v560_v27 = vld [vmem:[#allocation2 + $0x310] sm:$0xff]  ;;  %v561_v28 = vld [vmem:[#allocation2 + $0x320] sm:$0xf] }
 0x11f   :  { %v172_v9 = vpop.f32.mrb[0].mxu0 }
 0x120   :  { %v173_v10 = vadd.f32 %v172_v9, %v89_v7  ;;  %v174_v11 = vpop.f32.mrb[1].mxu0 }
 0x121   :  { %v175_v12 = vadd.f32 %v174_v11, %v93_v8  ;;  %v549_v11 = vld [vmem:[#allocation2 + $0x260] ss:$0 sm:$0xff] }
 0x122   :  { %v177_v14 = vmax.f32 %v173_v10, 0.0 }
 0x123   :  { %v178_v13 = vmax.f32 %v175_v12, 0.0 }
 0x125   :  { %1207 = vmatprep.mubr.msk.f32.mxu1 %vm179_vm2, %v178_v13 }
 0x126   :  { %248 = vmatmul.mubr.f32.vlgmr.msra.gmra.mrb[0].mxu1 %v177_v14  ;;  %v553_v14 = vld [vmem:[#allocation2 + $0x2b0] sm:$0xff] }
 0x127   :  { %1320 = vmatprep.mubr.msk.f32.mxu1 %vm1512_vm3, %v1510_v0 }
 0x1f9   :  { %v249_v19 = vpop.f32.mrb[0].mxu1 }
 0x1fa   :  { %v250_v20 = vadd.f32 %v249_v19, %v54_v18  ;;  %v251_v21 = vpop.f32.mrb[1].mxu1  ;;  %v1389_v18 = vpack.c.bf16 %v554_v15, %v553_v14 }
 0x1fb   :  { %v556_v21 = vld [vmem:[#allocation2 + $0x2e0] sm:$0xff] }
 0x1fc   :  { %1274 = vmatmul.mubr.msk.f32.vlgmr.msra.gmra.mrb[2].mxu0 %vm253_vm4, %v250_v20  ;;  %v555_v20 = vld [vmem:[#allocation2 + $0x2d0] sm:$0xff] }
 0x1fd   :  { %1280 = vmatprep.mubr.msk.f32.mxu0 %vm1512_vm3, %v1510_v0  ;;  %1381 = vmatpush3.bf16.msk.msra.mxu0 %vm1590_vm6, %v1379_v25  ;;  %v1392_v22 = vpack.c.bf16 %v556_v21, %v555_v20  ;;  %v1395_v25 = vpack.c.bf16 %v558_v24, %v557_v23 }
 0x1fe   :  { %1382 = vmatprep.subr.bf16.mxu0 %v1511_v1 }
 0x200   :  { %1281 = vmatmul.mubr.msk.f32.vlgmr.msra.gmra.mrb[4].mxu0 %vm356_vm8, %v353_v29  ;;  %v1398_v29 = vpack.c.bf16 %v561_v28, %v560_v27 }
 0x201   :  { %1293 = vmatprep.mubr.msk.f32.mxu0 %vm1512_vm3, %v1510_v0  ;;  %1384 = vmatpush3.bf16.msra.mxu0 %v1383_v39  ;;  %v824_v39 = vld [vmem:[#allocation2 + $0x330] sm:$0x7] }
 0x202   :  { %1385 = vmatprep.subr.bf16.mxu0 %v1511_v1  ;;  %1400 = vmatpush3.bf16.msk.msra.mxu1 %vm1590_vm6, %v1398_v29 }
 0x203   :  { %1323 = vmatprep.subr.mxu1 %v1510_v0 }
 0x205   :  { %1387 = vmatpush3.bf16.msra.mxu0 %v1386_v43 }
 0x206   :  { %1291 = vmatprep.subr.mxu0 %v1510_v0 }
 0x209   :  { %1292 = vmatpush3.msk.msra.mxu0 %vm99_vm0, %v438_v45 }
 0x20a   :  { %1296 = vmatprep.subr.mxu0 %v1510_v0 }
 0x2cf   :  { %v326_v30 = vpop.f32.mrb[2].mxu0 }
 0x2d0   :  { %v1275_v31 = vpop.f32.mrb[3].mxu0  ;;  %v330_v32 = vsel %vm253_vm4, %v326_v30, -inf }
 0x2d1   :  { %331 = vmax.xlane.f32.xlu1 %v330_v32 }
 0x2d3   :  { %v429_v42 = vpop.f32.mrb[4].mxu0 }
 0x2d4   :  { %v1282_v44 = vpop.f32.mrb[5].mxu0 }
 0x35e   :  { %v332_v4 = vpop.xlane.xlu1 %331 }
 0x35f   :  { %v333_v33 = vsub.f32 %v326_v30, %v332_v4  ;;  %v552_v30 = vld [vmem:[#allocation2 + $0x280] ss:$0 sm:$0xff] }
 0x361   :  { %v334_v34 = vmul.f32 1.442695, %v333_v33 }
 0x363   :  { %1425 = vpow2.f32 %v334_v34  ;;  %v825_v34 = vld [vmem:[#allocation2 + $0x340] sm:$0x7] }
 0x36d   :  { %v1426_v35 = vpop.eup %1425 }
 0x36e   :  { %v336_v36 = vsel %vm253_vm4, %v1426_v35, 0.0 }
 0x36f   :  { %337 = vadd.xlane.f32.xlu1 %v336_v36 }
 0x3fc   :  { %v338_v46 = vpop.xlane.xlu1 %337 }
 0x3fd   :  { %1427 = vrcp.f32 %v338_v46 }
 0x407   :  { %v1428_v47 = vpop.eup %1427 }
 0x408   :  { %v1608_v48 = vmul.f32 %v1428_v47, %v1426_v35  ;;  %v559_v35 = vld [vmem:[#allocation2 + $0x290] ss:$0 sm:$0xff] }
 0x40a   :  { %v433_v49 = vmul.f32 %v429_v42, %v1608_v48  ;;  %v518_v41 = vsel %vm253_vm4, %v1608_v48, 0.0 }
 0x40b   :  { %v519_v42 = vrot.slane %v518_v41, 4 }
 0x40c   :  { %1294 = vmatmul.mubr.msk.f32.vlgmr.msra.gmra.mrb[6].mxu0 %vm253_vm4, %v433_v49 }
 0x40d   :  { %1298 = vmatprep.mubr.msk.f32.mxu0 %vm1512_vm3, %v1510_v0  ;;  %1297 = vmatpush3.msk.msra.mxu0 %vm539_vm9, %v551_v50  ;;  %v520_v43 = vadd.f32 %v519_v42, %v518_v41  ;;  %v982_v50 = vld [vmem:[#allocation2 + $0x350] sm:$0x3f] }
 0x40e   :  { %1388 = vmatprep.subr.bf16.mxu0 %v1511_v1 }
 0x40f   :  { %v521_v44 = vrot.slane %v520_v43, 2 }
 0x411   :  { %v522_v45 = vadd.f32 %v521_v44, %v520_v43 }
 0x413   :  { %v523_v46 = vrot.slane %v522_v45, 1 }
 0x415   :  { %v524_v47 = vadd.f32 %v523_v46, %v522_v45 }
 0x417   :  { %v525_v49 = vmul.f32 0.125, %v524_v47 }
 0x4df   :  { %v1616_v51 = vpop.f32.mrb[6].mxu0 }
 0x4e0   :  { %v563_v52 = vsel %vm562_vm10, %v1616_v51, 0.0  ;;  %v1295_v53 = vpop.f32.mrb[7].mxu0 }
 0x4e1   :  { %v564_v54 = vrot.slane %v563_v52, 4 }
 0x4e3   :  { %v565_v55 = vadd.f32 %v564_v54, %v563_v52  ;;  %v515_v52 = vld [vmem:[#allocation2 + $0x230] sm:$0x7] }
 0x4e4   :  { %v526_v53 = vmul.f32 %v525_v49, %v515_v52  ;;  %v527_v54 = vsub.f32 1.0, %v515_v52 }
 0x4e5   :  { %v566_v56 = vrot.slane %v565_v55, 2 }
 0x4e7   :  { %v567_v57 = vadd.f32 %v566_v56, %v565_v55  ;;  %v528_v56 = vsub.f32 %v526_v53, %v527_v54 }
 0x4e9   :  { %v568_v58 = vrot.slane %v567_v57, 1 }
 0x4eb   :  { %v569_v59 = vadd.f32 %v568_v58, %v567_v57 }
 0x4ed   :  { %v570_v60 = vmul.f32 0.125, %v569_v59 }
 0x4ef   :  { %v571_v61 = vsub.f32 %v1616_v51, %v570_v60  ;;  %v530_v60 = vsel %vm529_vm13, %v528_v56, -inf }
 0x4f1   :  { %v572_v62 = vmul.f32 %v571_v61, %v571_v61 }
 0x4f3   :  { %v573_v63 = vsel %vm562_vm10, %v572_v62, 0.0 }
 0x4f4   :  { %v574_v2 = vrot.slane %v573_v63, 4 }
 0x4f6   :  { %v575_v3 = vadd.f32 %v574_v2, %v573_v63 }
 0x4f8   :  { %v576_v5 = vrot.slane %v575_v3, 2 }
 0x4fa   :  { %v577_v6 = vadd.f32 %v576_v5, %v575_v3 }
 0x4fc   :  { %v578_v7 = vrot.slane %v577_v6, 1 }
 0x4fe   :  { %v579_v8 = vadd.f32 %v578_v7, %v577_v6  ;;  %v1062_v7 = vld [vmem:[#allocation2 + $0x360] sm:$0xff] }
 0x500   :  { %v580_v9 = vmul.f32 0.125, %v579_v8  ;;  %v1063_v8 = vld [vmem:[#allocation2 + $0x370] sm:$0xf] }
 0x502   :  { %v581_v10 = vadd.f32 1e-05, %v580_v9  ;;  %v1402_v9 = vpack.c.bf16 %v1063_v8, %v1062_v7 }
 0x504   :  { %1429 = vrsqrt.f32 %v581_v10 }
 0x50e   :  { %v1430_v12 = vpop.eup %1429 }
 0x50f   :  { %v583_v13 = vmul.f32 %v1430_v12, %v549_v11 }
 0x511   :  { %v584_v17 = vmul.f32 %v583_v13, %v571_v61 }
 0x513   :  { %v585_v19 = vadd.f32 %v584_v17, %v550_v16 }
 0x515   :  { %1299 = vmatmul.mubr.msk.f32.vlgmr.msra.gmra.mrb[8].mxu0 %vm562_vm10, %v585_v19  ;;  %v1140_v19 = vld [vmem:[#allocation2 + $0x380] sm:$0x3] }
 0x516   :  { %1390 = vmatpush3.bf16.msra.mxu0 %v1389_v18  ;;  %1313 = vmatprep.mubr.msk.f32.mxu0 %vm1512_vm3, %v1510_v0 }
 0x517   :  { %1391 = vmatprep.subr.bf16.mxu0 %v1511_v1 }
 0x51a   :  { %1393 = vmatpush3.bf16.msra.mxu0 %v1392_v22  ;;  %v1152_v22 = vsub.f32 1.0, %v1140_v19 }
 0x51b   :  { %1394 = vmatprep.subr.bf16.mxu0 %v1511_v1 }
 0x51e   :  { %1396 = vmatpush3.bf16.msra.mxu0 %v1395_v25  ;;  %v516_v25 = vld [vmem:[#allocation2 + $0x240] sm:$0x7] }
 0x51f   :  { %1328 = vmatprep.subr.mxu0 %v1510_v0 }
 0x5e8   :  { %v658_v31 = vpop.f32.mrb[8].mxu0 }
 0x5e9   :  { %v659_v32 = vadd.f32 %v658_v31, %v552_v30  ;;  %v1300_v4 = vpop.f32.mrb[9].mxu0 }
 0x5ea   :  { %v1141_v4 = vld [vmem:[#allocation2 + $0x390] sm:$0x3] }
 0x5eb   :  { %v662_v33 = vmax.f32 %v659_v32, 0.0 }
 0x5ed   :  { %1314 = vmatmul.mubr.msk.f32.vlgmr.msra.gmra.mrb[10].mxu0 %vm663_vm11, %v662_v33 }
 0x5ee   :  { %1329 = vmatpush3.msk.msra.mxu0 %vm539_vm9, %v825_v34  ;;  %1330 = vmatprep.mubr.msk.f32.mxu0 %vm1512_vm3, %v1510_v0 }
 0x5ef   :  { %1401 = vmatprep.subr.bf16.mxu0 %v1511_v1 }
 0x5f1   :  { %1331 = vmatmul.mubr.msk.f32.vlgmr.msra.gmra.mrb[12].mxu0 %vm562_vm10, %v1616_v51 }
 0x5f2   :  { %1342 = vmatprep.mubr.msk.f32.mxu0 %vm1512_vm3, %v1510_v0  ;;  %1404 = vmatpush3.bf16.msk.msra.mxu0 %vm1590_vm6, %v1402_v9 }
 0x6c0   :  { %v733_v36 = vpop.f32.mrb[10].mxu0 }
 0x6c1   :  { %v734_v37 = vadd.f32 %v733_v36, %v559_v35  ;;  %v1315_v38 = vpop.f32.mrb[11].mxu0  ;;  %v517_v35 = vld [vmem:[#allocation2 + $0x250] sm:$0x7] }
 0x6c3   :  { %1321 = vmatmul.mubr.msk.f32.vlgmr.msra.gmra.mrb[2].mxu1 %vm356_vm8, %v734_v37 }
 0x6c4   :  { %v971_v40 = vpop.f32.mrb[12].mxu0  ;;  %1324 = vmatpush3.msk.msra.mxu1 %vm539_vm9, %v824_v39  ;;  %1325 = vmatprep.mubr.msk.f32.mxu1 %vm1512_vm3, %v1510_v0 }
 0x6c5   :  { %v1332_v1 = vpop.f32.mrb[13].mxu0  ;;  %1333 = vmatprep.subr.mxu1 %v1510_v0 }
 0x6c7   :  { %1326 = vmatmul.mubr.msk.f32.vlgmr.msra.gmra.mrb[4].mxu1 %vm562_vm10, %v1616_v51 }
 0x6c8   :  { %1335 = vmatprep.mubr.msk.f32.mxu1 %vm1512_vm3, %v1510_v0  ;;  %1334 = vmatpush3.msk.msra.mxu1 %vm987_vm12, %v982_v50 }
 0x796   :  { %v809_v51 = vpop.f32.mrb[2].mxu1 }
 0x797   :  { %v1322_v55 = vpop.f32.mrb[3].mxu1  ;;  %v813_v0 = vsel %vm356_vm8, %v809_v51, -inf }
 0x798   :  { %814 = vmax.xlane.f32.xlu1 %v813_v0 }
 0x79a   :  { %v898_v48 = vpop.f32.mrb[4].mxu1 }
 0x79b   :  { %v975_v57 = vadd.f32 %v971_v40, %v898_v48  ;;  %v976_v58 = vmul.f32 %v971_v40, %v898_v48  ;;  %v1327_v59 = vpop.f32.mrb[5].mxu1 }
 0x79c   :  { %531 = vmax.xlane.f32.xlu1 %v530_v60 }
 0x79d   :  { %978 = vrot.lane.b32.xlu0 %v976_v58, %s1516_s28 }
 0x80f   :  { %v979_v61 = vpop.permute.xlu0 %978 }
 0x810   :  { %v981_v62 = vsel %vm562_vm10, %v975_v57, %v979_v61 }
 0x811   :  { %1336 = vmatmul.mubr.msk.f32.vlgmr.msra.gmra.mrb[6].mxu1 %vm983_vm14, %v981_v62 }
 0x825   :  { %v815_v63 = vpop.xlane.xlu1 %814 }
 0x826   :  { %v816_v2 = vsub.f32 %v809_v51, %v815_v63 }
 0x828   :  { %v817_v3 = vmul.f32 1.442695, %v816_v2 }
 0x829   :  { %v532_v23 = vpop.xlane.xlu1 %531 }
 0x82a   :  { %1431 = vpow2.f32 %v817_v3  ;;  %vm533_vm0 = vcmp.ge.f32.partialorder %v528_v56, %v532_v23 }
 0x82b   :  { %v534_v31 = vsel %vm533_vm0, %v516_v25, 12.0 }
 0x82c   :  { %v535_v32 = vsel %vm529_vm13, %v534_v31, inf }
 0x834   :  { %v1432_v5 = vpop.eup %1431 }
 0x835   :  { %v819_v6 = vsel %vm356_vm8, %v1432_v5, 0.0 }
 0x836   :  { %820 = vadd.xlane.f32.xlu0 %v819_v6 }
 0x8c3   :  { %v821_v10 = vpop.xlane.xlu0 %820 }
 0x8c4   :  { %1433 = vrcp.f32 %v821_v10 }
 0x8ce   :  { %v1434_v11 = vpop.eup %1433 }
 0x8cf   :  { %v823_v12 = vmul.f32 %v1434_v11, %v1432_v5 }
 0x8d1   :  { %v1143_v13 = vsel %vm356_vm8, %v823_v12, 0.0 }
 0x8d2   :  { %v1144_v14 = vrot.slane %v1143_v13, 4 }
 0x8d4   :  { %v1145_v15 = vadd.f32 %v1144_v14, %v1143_v13 }
 0x8d6   :  { %v1146_v16 = vrot.slane %v1145_v15, 2 }
 0x8d8   :  { %v1147_v17 = vadd.f32 %v1146_v16, %v1145_v15 }
 0x8da   :  { %v1148_v18 = vrot.slane %v1147_v17, 1 }
 0x8dc   :  { %v1149_v20 = vadd.f32 %v1148_v18, %v1147_v17 }
 0x8de   :  { %v1150_v21 = vmul.f32 0.125, %v1149_v20 }
 0x8e0   :  { %v1151_v24 = vmul.f32 %v1150_v21, %v1140_v19 }
 0x8e2   :  { %v1153_v26 = vsub.f32 %v1151_v24, %v1152_v22 }
 0x8e4   :  { %v1057_v27 = vpop.f32.mrb[6].mxu1  ;;  %v1155_v28 = vsel %vm1154_vm15, %v1153_v26, -inf }
 0x8e5   :  { %v1061_v29 = vmul.f32 %v1057_v27, %v823_v12  ;;  %1156 = vmax.xlane.f32.xlu1 %v1155_v28  ;;  %v1337_v30 = vpop.f32.mrb[7].mxu1 }
 0x8e7   :  { %1343 = vmatmul.mubr.msk.f32.vlgmr.msra.gmra.mrb[14].mxu0 %vm356_vm8, %v1061_v29 }
 0x8e9   :  { %536 = vmin.xlane.f32.xlu1 %v535_v32 }
 0x972   :  { %v1157_v33 = vpop.xlane.xlu1 %1156 }
 0x973   :  { %vm1158_vm1 = vcmp.ge.f32.partialorder %v1153_v26, %v1157_v33 }
 0x974   :  { %v1159_v34 = vsel %vm1158_vm1, %v1141_v4, 6.0 }
 0x975   :  { %v1160_v36 = vsel %vm1154_vm15, %v1159_v34, inf }
 0x976   :  { %1161 = vmin.xlane.f32.xlu1 %v1160_v36  ;;  %v537_v37 = vpop.xlane.xlu1 %536 }
 0x977   :  { %v538_v38 = vmul.f32 %v537_v37, %v517_v35 }
 0x979   :  { %v540_v39 = vsel %vm539_vm9, %v538_v38, 0.0 }
 0x97a   :  { %v541_v40 = vrot.slane %v540_v39, 4 }
 0x97c   :  { %v542_v1 = vadd.f32 %v541_v40, %v540_v39 }
 0x97e   :  { %v543_v41 = vrot.slane %v542_v1, 2 }
 0x980   :  { %v544_v42 = vadd.f32 %v543_v41, %v542_v1 }
 0x982   :  { %v545_v43 = vrot.slane %v544_v42, 1 }
 0x984   :  { %v546_v44 = vadd.f32 %v545_v43, %v544_v42 }
 0x986   :  { %v1405_v45 = vtrunc.f32 %v546_v44 }
 0x988   :  { %v1406_v46 = vcvt.f32.s32 %v1405_v45 }
 0x98a   :  { %548 = vst [vmem:[#allocation6] sm:$0x1] %v1406_v46 }
 0x9ba   :  { %v1136_v47 = vpop.f32.mrb[14].mxu0 }
 0x9bb   :  { %1174 = vst [vmem:[#allocation5] sm:$0xff] %v1136_v47  ;;  %v1344_v49 = vpop.f32.mrb[15].mxu0 }
 0x9bc   :  { %1468 = shalt.err (!%p1465_p12)
}
 0x9bd   :  { %s1469_s7 = scalar_lea.hbm %s1688_s2, 128 }
 0x9be   :  { %p1470_p13 = scmp.ne.s32.totalorder %s1688_s2, %s1469_s7  ;;  %p1473_p0 = scmp.lt.u32.totalorder %s1469_s7, %s1688_s2 }
 0x9c0   :  { %p1475_p1 = pnand %p1473_p0, %p1470_p13 }
 0x9c2   :  { %1478 = shalt.err (!%p1475_p1)
}
 0x9c3   :  { %1184 = dma.vmem_to_hbm [thread:$0]  %s1182_s30, 128, %s1688_s2, [#allocation4]   ;;  %v1142_v50 = vld [vmem:[#allocation2 + $0x3a0] sm:$0x3]  ;;  %vm1164_vm2 = vcmask 1041408  }
 0x9c4   :  { %s1518_s14 = smov [#allocation6]  }
 0x9c5   :  { %s1191_s15 = sshll.u32 %s1518_s14, 4  ;;  %s1192_s15 = int_to_ptr.vmem [resolvable:$true] %s1191_s15 }
 0x9c6   :  { %s1479_s16 = scalar_lea.vmem %s1192_s15, 32  ;;  %p1484_p3 = scmp.lt.s32.totalorder %s1192_s15, %s1192_s15 }
 0x9c7   :  { %p1480_p2 = scmp.ne.s32.totalorder %s1192_s15, %s1479_s16  ;;  %p1485_p4 = scmp.lt.s32.totalorder %s1479_s16, %s1479_s16 }
 0x9c9   :  { %p1486_p5 = por %p1485_p4, %p1484_p3 }
 0x9cb   :  { %p1487_p6 = pnand %p1486_p5, %p1480_p2 }
 0xa03   :  { %v1162_v52 = vpop.xlane.xlu1 %1161 }
 0xa04   :  { %v1163_v53 = vmul.f32 %v1162_v52, %v1142_v50 }
 0xa06   :  { %v1165_v54 = vsel %vm1164_vm2, %v1163_v53, 0.0 }
 0xa07   :  { %v1166_v51 = vrot.slane %v1165_v54, 4 }
 0xa09   :  { %v1167_v55 = vadd.f32 %v1166_v51, %v1165_v54 }
 0xa0b   :  { %v1168_v0 = vrot.slane %v1167_v55, 2 }
 0xa0d   :  { %v1169_v56 = vadd.f32 %v1168_v0, %v1167_v55 }
 0xa0f   :  { %v1170_v48 = vrot.slane %v1169_v56, 1 }
 0xa11   :  { %v1171_v57 = vadd.f32 %v1170_v48, %v1169_v56 }
 0xa13   :  { %v1407_v58 = vtrunc.f32 %v1171_v57 }
 0xa15   :  { %v1408_v59 = vcvt.f32.s32 %v1407_v58 }
 0xa17   :  { %1173 = vst [vmem:[#allocation6 + $0x1] sm:$0x1] %v1408_v59 }
 0xa18   :  { %1490 = shalt.err (!%p1487_p6)
}
 0xa19   :  { %s1491_s18 = scalar_lea.hbm %s1689_s3, 32 }
 0xa1a   :  { %p1492_p7 = scmp.ne.s32.totalorder %s1689_s3, %s1491_s18  ;;  %p1495_p8 = scmp.lt.u32.totalorder %s1491_s18, %s1689_s3 }
 0xa1c   :  { %p1497_p9 = pnand %p1495_p8, %p1492_p7 }
 0xa1e   :  { %1500 = shalt.err (!%p1497_p9)
}
 0xa1f   :  { %1194 = dma.vmem_to_hbm [thread:$0]  %s1192_s15, 32, %s1689_s3, [#allocation7]  }
 0xa20   :  { %1503 = dma.done.wait [#allocation4], 128  }
 0xa21   :  { %1504 = vsyncadd [#allocation4], 4294967168 }
 0xa22   :  { %1505 = dma.done.wait [#allocation7], 32  }
 0xa23   :  { %1506 = vsyncadd [#allocation7], 4294967264 }
 0xa24   :  { %1201 = vsyncpa [#allocation3], 1 }
 0xa25   :  { %1202 = vsyncpa [#allocation4], 1 }
 0xa26   :  { %1203 = vsyncpa [#allocation7], 1 }

</bundles_post_ra>
